<compile_context>
chip_gen: v5e
topology: v5e:2x2
jax: 0.10.0
libtpu: 0.0.40
codegen_flags: <defaults>
</compile_context>

<pallas_src>
import functools

import jax
import jax.numpy as jnp
from jax.experimental import pallas as pl
from jax.experimental.pallas import tpu as pltpu


def _pick_hw_tile(hw, c, itemsize, target_bytes=4 * 1024 * 1024):
    """Spatial tile: largest multiple of 128 keeping one block under ~4 MiB.

    Sized so the double-buffered input blocks stay well inside the scoped VMEM
    budget on all generations (v5e/v6e 128 MiB, v7x 64 MiB physical).
    """
    if hw * c * itemsize <= target_bytes or hw <= 128:
        return int(hw)                       # single full-extent block
    t = (target_bytes // (c * itemsize)) // 128 * 128
    t = max(128, min(int(t), (hw // 128) * 128))
    return int(t)


def fc_kernel(p_ref, w1t_ref, w2t_ref, o_ref):
    # p_ref : (2N, C)  pooled rows (avg/max stacked), f32
    # w1t   : (C, Ch)  squeeze weight, pre-transposed
    # w2t   : (Ch, C)  excite weight, pre-transposed
    # o_ref : (2N, C)  sigmoid(relu(p @ w1t) @ w2t)
    h = jnp.maximum(
        jnp.dot(p_ref[...], w1t_ref[...], preferred_element_type=jnp.float32), 0.0)
    o_ref[...] = jax.nn.sigmoid(
        jnp.dot(h, w2t_ref[...], preferred_element_type=jnp.float32))


@functools.partial(jax.jit, static_argnames=("hw_tile",))
def chan_attn(x, w1, w2, hw_tile=None):
    """x: (N, C, H, W), w1: (Ch, C), w2: (C, Ch) -> (N, C, 1, 1)"""
    N, C, H, W = x.shape
    HW = H * W
    xf = x.reshape(N, C, HW)                 # free: NCHW is already contiguous
    if hw_tile is None:
        hw_tile = _pick_hw_tile(HW, C, x.dtype.itemsize)
    if hw_tile != HW:
        assert hw_tile % 128 == 0, hw_tile   # (8,128) lane rule for sub-blocks
    num_t = pl.cdiv(HW, hw_tile)
    needs_mask = (HW % hw_tile) != 0
    inv_hw = 1.0 / float(HW)

    def pool_kernel(x_ref, o_ref, sum_sc, max_sc):
        # x_ref : (C, hw_tile) block of one batch element, input dtype
        # o_ref : (C, 2)       pooled output (col 0 = avg, col 1 = max), f32
        # sum_sc/max_sc : (C, 1) f32 running accumulators
        t = pl.program_id(1)

        @pl.when(t == 0)
        def _():
            sum_sc[...] = jnp.zeros_like(sum_sc)
            max_sc[...] = jnp.full_like(max_sc, -jnp.inf)

        xv = x_ref[...]                      # stay in input dtype; no full-tile cast
        if needs_mask:
            valid = jnp.minimum(hw_tile, HW - t * hw_tile)
            lane = jax.lax.broadcasted_iota(jnp.int32, (C, hw_tile), 1)
            m = lane < valid
            xs = jnp.where(m, xv, jnp.zeros_like(xv))
            xm = jnp.where(m, xv, jnp.full_like(xv, -jnp.inf))
        else:
            xs = xv
            xm = xv

        # Widen only at the (C, 1) partial results.
        sum_sc[...] += jnp.sum(xs, axis=-1, keepdims=True, dtype=jnp.float32)
        max_sc[...] = jnp.maximum(
            max_sc[...], jnp.max(xm, axis=-1, keepdims=True).astype(jnp.float32))

        @pl.when(t == num_t - 1)
        def _():
            o_ref[:, 0:1] = sum_sc[...] * inv_hw      # divide by the true H*W
            o_ref[:, 1:2] = max_sc[...]

    pooled = pl.pallas_call(
        pool_kernel,
        out_shape=jax.ShapeDtypeStruct((N, C, 2), jnp.float32),
        grid_spec=pltpu.PrefetchScalarGridSpec(
            num_scalar_prefetch=0,
            grid=(N, num_t),
            in_specs=[pl.BlockSpec((None, C, hw_tile), lambda n, t: (n, 0, t))],
            out_specs=pl.BlockSpec((None, C, 2), lambda n, t: (n, 0, 0)),
            scratch_shapes=[pltpu.VMEM((C, 1), jnp.float32),
                            pltpu.VMEM((C, 1), jnp.float32)],
        ),
        compiler_params=pltpu.CompilerParams(
            dimension_semantics=("parallel", "arbitrary"),
            vmem_limit_bytes=32 * 1024 * 1024,
        ),
        cost_estimate=pl.CostEstimate(
            flops=2 * N * C * HW,
            transcendentals=0,
            bytes_accessed=N * C * HW * x.dtype.itemsize + N * C * 2 * 4,
        ),
    )(xf)

    # Batched excitation FC over all 2N pooled vectors (tiny, well-shaped).
    pm = pooled.transpose(0, 2, 1).reshape(2 * N, C)   # rows: [avg_n, max_n] per n
    w1t = w1.astype(jnp.float32).T                     # (C, Ch)
    w2t = w2.astype(jnp.float32).T                     # (Ch, C)
    y = pl.pallas_call(
        fc_kernel,
        out_shape=jax.ShapeDtypeStruct((2 * N, C), jnp.float32),
    )(pm, w1t, w2t)

    y = y.reshape(N, 2, C)
    out = (y[:, 0] + y[:, 1]).astype(x.dtype)          # avg-path + max-path
    return out.reshape(N, C, 1, 1)


def chan_attn_ref(x, w1, w2):
    """Pure-JAX reference (mirrors the PyTorch module)."""
    avg = jnp.mean(x, axis=(2, 3))          # (N, C)
    mx = jnp.max(x, axis=(2, 3))            # (N, C)

    def fc(v):
        h = jnp.maximum(v @ w1.T, 0.0)
        return jax.nn.sigmoid(h @ w2.T)

    return (fc(avg) + fc(mx))[:, :, None, None]


if __name__ == "__main__":
    ratio = 16

    # Case 1: module-default-style shapes (ratio=16 requires C % 16 == 0).
    N, C, H, W = 2, 64, 16, 16
    Ch = C // ratio
    kx, k1, k2 = jax.random.split(jax.random.PRNGKey(0), 3)
    x = jax.random.normal(kx, (N, C, H, W), dtype=jnp.float32)
    # Conv2d 1x1, bias=False weights: fc[0] -> (Ch, C), fc[2] -> (C, Ch).
    w1 = jax.random.normal(k1, (Ch, C), dtype=jnp.float32) * 0.1
    w2 = jax.random.normal(k2, (C, Ch), dtype=jnp.float32) * 0.1

    ref = chan_attn_ref(x, w1, w2)

    out = jax.block_until_ready(chan_attn(x, w1, w2))
    assert out.shape == (N, C, 1, 1), out.shape
    assert jnp.allclose(out, ref, atol=1e-5, rtol=1e-5), float(
        jnp.max(jnp.abs(out - ref)))

    # Explicitly exercise the multi-tile streaming path (2 spatial tiles).
    out2 = jax.block_until_ready(chan_attn(x, w1, w2, hw_tile=128))
    assert jnp.allclose(out2, ref, atol=1e-5, rtol=1e-5), float(
        jnp.max(jnp.abs(out2 - ref)))

    # Case 2: spatial extent not a multiple of the tile -> masked last tile.
    N2, C2, H2, W2 = 1, 32, 18, 14
    Ch2 = C2 // ratio
    kx2, k3, k4 = jax.random.split(jax.random.PRNGKey(1), 3)
    x2 = jax.random.normal(kx2, (N2, C2, H2, W2), dtype=jnp.float32)
    w1b = jax.random.normal(k3, (Ch2, C2), dtype=jnp.float32) * 0.1
    w2b = jax.random.normal(k4, (C2, Ch2), dtype=jnp.float32) * 0.1
    ref2 = chan_attn_ref(x2, w1b, w2b)
    out3 = jax.block_until_ready(chan_attn(x2, w1b, w2b, hw_tile=128))
    assert jnp.allclose(out3, ref2, atol=1e-5, rtol=1e-5), float(
        jnp.max(jnp.abs(out3 - ref2)))

    print("KERNEL_OK")
</pallas_src>

<mosaic_0001>
module attributes {stable_mosaic.version = 11 : i64} {
  func.func @pool_kernel(%arg0: i32, %arg1: i32, %arg2: memref<1x64x256xf32, #tpu.memory_space<vmem>>, %arg3: memref<1x64x2xf32, #tpu.memory_space<vmem>>, %arg4: memref<64x1xf32, #tpu.memory_space<vmem>>, %arg5: memref<64x1xf32, #tpu.memory_space<vmem>>) attributes {dimension_semantics = [#tpu.dimension_semantics<parallel>, #tpu.dimension_semantics<arbitrary>], iteration_bounds = array<i64: 2, 1>, scalar_prefetch = 0 : i64, scratch_operands = 2 : i64, tpu.core_type = #tpu.core_type<tc>, window_params = [{transform_indices = @transform_0, window_bounds = array<i64: 1, 64, 256>}, {transform_indices = @transform_1, window_bounds = array<i64: 1, 64, 2>}]} {
    %c0_i32 = arith.constant 0 : i32
    %0 = arith.cmpi eq, %arg1, %c0_i32 : i32
    %1 = arith.extui %0 : i1 to i32
    %c0_i32_0 = arith.constant 0 : i32
    %2 = arith.cmpi ne, %1, %c0_i32_0 : i32
    scf.if %2 {
      %cst_14 = arith.constant 0.000000e+00 : f32
      %18 = vector.broadcast %cst_14 : f32 to vector<64x1xf32>
      %c0_15 = arith.constant 0 : index
      %c0_16 = arith.constant 0 : index
      %19 = vector.load %arg4[%c0_15, %c0_16] : memref<64x1xf32, #tpu.memory_space<vmem>>, vector<64x1xf32>
      tpu.vector_store %arg4[%c0_15, %c0_16], %18 {strides = array<i32>} : memref<64x1xf32, #tpu.memory_space<vmem>>, vector<64x1xf32>,
      %cst_17 = arith.constant 0xFF800000 : f32
      %20 = vector.broadcast %cst_17 : f32 to vector<64x1xf32>
      %c0_18 = arith.constant 0 : index
      %c0_19 = arith.constant 0 : index
      %21 = vector.load %arg5[%c0_18, %c0_19] : memref<64x1xf32, #tpu.memory_space<vmem>>, vector<64x1xf32>
      tpu.vector_store %arg5[%c0_18, %c0_19], %20 {strides = array<i32>} : memref<64x1xf32, #tpu.memory_space<vmem>>, vector<64x1xf32>,
    } else {
    }
    %c0 = arith.constant 0 : index
    %c0_1 = arith.constant 0 : index
    %c0_2 = arith.constant 0 : index
    %3 = vector.load %arg2[%c0, %c0_1, %c0_2] : memref<1x64x256xf32, #tpu.memory_space<vmem>>, vector<1x64x256xf32>
    %4 = vector.shape_cast %3 : vector<1x64x256xf32> to vector<64x256xf32>
    %c0_3 = arith.constant 0 : index
    %c0_4 = arith.constant 0 : index
    %5 = vector.load %arg4[%c0_3, %c0_4] : memref<64x1xf32, #tpu.memory_space<vmem>>, vector<64x1xf32>
    %cst = arith.constant dense<0.000000e+00> : vector<64xf32>
    %6 = vector.multi_reduction <add>, %4, %cst [1] : vector<64x256xf32> to vector<64xf32>
    %7 = vector.shape_cast %6 : vector<64xf32> to vector<64x1xf32>
    %8 = arith.addf %5, %7 : vector<64x1xf32>
    %c0_5 = arith.constant 0 : index
    %c0_6 = arith.constant 0 : index
    %9 = vector.load %arg4[%c0_5, %c0_6] : memref<64x1xf32, #tpu.memory_space<vmem>>, vector<64x1xf32>
    tpu.vector_store %arg4[%c0_5, %c0_6], %8 {strides = array<i32>} : memref<64x1xf32, #tpu.memory_space<vmem>>, vector<64x1xf32>,
    %c0_7 = arith.constant 0 : index
    %c0_8 = arith.constant 0 : index
    %10 = vector.load %arg5[%c0_7, %c0_8] : memref<64x1xf32, #tpu.memory_space<vmem>>, vector<64x1xf32>
    %cst_9 = arith.constant dense<0xFF800000> : vector<64xf32>
    %11 = vector.multi_reduction <maximumf>, %4, %cst_9 [1] : vector<64x256xf32> to vector<64xf32>
    %12 = vector.shape_cast %11 : vector<64xf32> to vector<64x1xf32>
    %13 = arith.maximumf %10, %12 : vector<64x1xf32>
    %c0_10 = arith.constant 0 : index
    %c0_11 = arith.constant 0 : index
    %14 = vector.load %arg5[%c0_10, %c0_11] : memref<64x1xf32, #tpu.memory_space<vmem>>, vector<64x1xf32>
    tpu.vector_store %arg5[%c0_10, %c0_11], %13 {strides = array<i32>} : memref<64x1xf32, #tpu.memory_space<vmem>>, vector<64x1xf32>,
    %c0_i32_12 = arith.constant 0 : i32
    %15 = arith.cmpi eq, %arg1, %c0_i32_12 : i32
    %16 = arith.extui %15 : i1 to i32
    %c0_i32_13 = arith.constant 0 : i32
    %17 = arith.cmpi ne, %16, %c0_i32_13 : i32
    scf.if %17 {
      %c0_14 = arith.constant 0 : index
      %c0_15 = arith.constant 0 : index
      %18 = vector.load %arg4[%c0_14, %c0_15] : memref<64x1xf32, #tpu.memory_space<vmem>>, vector<64x1xf32>
      %cst_16 = arith.constant 3.906250e-03 : f32
      %19 = vector.broadcast %cst_16 : f32 to vector<64x1xf32>
      %20 = arith.mulf %18, %19 : vector<64x1xf32>
      %c0_17 = arith.constant 0 : index
      %c0_18 = arith.constant 0 : index
      %c0_19 = arith.constant 0 : index
      %21 = vector.load %arg3[%c0_17, %c0_18, %c0_19] : memref<1x64x2xf32, #tpu.memory_space<vmem>>, vector<1x64x1xf32>
      %22 = vector.shape_cast %21 : vector<1x64x1xf32> to vector<64x1xf32>
      %23 = vector.shape_cast %20 : vector<64x1xf32> to vector<1x64x1xf32>
      tpu.vector_store %arg3[%c0_17, %c0_18, %c0_19], %23 {strides = array<i32>} : memref<1x64x2xf32, #tpu.memory_space<vmem>>, vector<1x64x1xf32>,
      %c0_20 = arith.constant 0 : index
      %c0_21 = arith.constant 0 : index
      %24 = vector.load %arg5[%c0_20, %c0_21] : memref<64x1xf32, #tpu.memory_space<vmem>>, vector<64x1xf32>
      %c0_22 = arith.constant 0 : index
      %c0_23 = arith.constant 0 : index
      %c1 = arith.constant 1 : index
      %25 = vector.load %arg3[%c0_22, %c0_23, %c1] : memref<1x64x2xf32, #tpu.memory_space<vmem>>, vector<1x64x1xf32>
      %26 = vector.shape_cast %25 : vector<1x64x1xf32> to vector<64x1xf32>
      %27 = vector.shape_cast %24 : vector<64x1xf32> to vector<1x64x1xf32>
      tpu.vector_store %arg3[%c0_22, %c0_23, %c1], %27 {strides = array<i32>} : memref<1x64x2xf32, #tpu.memory_space<vmem>>, vector<1x64x1xf32>,
    } else {
    }
    return
  }
  func.func @transform_0(%arg0: i32, %arg1: i32) -> (i32, i32, i32) {
    %c0_i32 = arith.constant 0 : i32
    %c0_i32_0 = arith.constant 0 : i32
    return %arg0, %c0_i32, %arg1 : i32, i32, i32
  }
  func.func @transform_1(%arg0: i32, %arg1: i32) -> (i32, i32, i32) {
    %c0_i32 = arith.constant 0 : i32
    %c0_i32_0 = arith.constant 0 : i32
    %c0_i32_1 = arith.constant 0 : i32
    return %arg0, %c0_i32, %c0_i32_0 : i32, i32, i32
  }
}

module attributes {stable_mosaic.version = 11 : i64} {
  func.func @fc_kernel(%arg0: memref<4x64xf32, #tpu.memory_space<vmem>>, %arg1: memref<64x4xf32, #tpu.memory_space<vmem>>, %arg2: memref<4x64xf32, #tpu.memory_space<vmem>>, %arg3: memref<4x64xf32, #tpu.memory_space<vmem>>) attributes {dimension_semantics = [], scalar_prefetch = 0 : i64, scratch_operands = 0 : i64, tpu.core_type = #tpu.core_type<tc>} {
    %c0 = arith.constant 0 : index
    %c0_0 = arith.constant 0 : index
    %0 = vector.load %arg0[%c0, %c0_0] : memref<4x64xf32, #tpu.memory_space<vmem>>, vector<4x64xf32>
    %c0_1 = arith.constant 0 : index
    %c0_2 = arith.constant 0 : index
    %1 = vector.load %arg1[%c0_1, %c0_2] : memref<64x4xf32, #tpu.memory_space<vmem>>, vector<64x4xf32>
    %cst = arith.constant dense<0.000000e+00> : vector<4x4xf32>
    %2 = tpu.matmul %0, %1, %cst {dimension_numbers = #tpu.dot_dimension_numbers<[1], [0], [0], [1], [0, 0, 1, 1], [], []>} : vector<4x64xf32>, vector<64x4xf32>, vector<4x4xf32> -> vector<4x4xf32>
    %cst_3 = arith.constant 0.000000e+00 : f32
    %3 = vector.broadcast %cst_3 : f32 to vector<4x4xf32>
    %4 = arith.maximumf %2, %3 : vector<4x4xf32>
    %c0_4 = arith.constant 0 : index
    %c0_5 = arith.constant 0 : index
    %5 = vector.load %arg2[%c0_4, %c0_5] : memref<4x64xf32, #tpu.memory_space<vmem>>, vector<4x64xf32>
    %cst_6 = arith.constant dense<0.000000e+00> : vector<4x64xf32>
    %6 = tpu.matmul %4, %5, %cst_6 {dimension_numbers = #tpu.dot_dimension_numbers<[1], [0], [0], [1], [0, 0, 1, 1], [], []>} : vector<4x4xf32>, vector<4x64xf32>, vector<4x64xf32> -> vector<4x64xf32>
    %7 = arith.negf %6 : vector<4x64xf32>
    %8 = math.exp %7 : vector<4x64xf32>
    %cst_7 = arith.constant 1.000000e+00 : f32
    %9 = vector.broadcast %cst_7 : f32 to vector<4x64xf32>
    %10 = arith.addf %9, %8 : vector<4x64xf32>
    %11 = arith.divf %9, %10 : vector<4x64xf32>
    %c0_8 = arith.constant 0 : index
    %c0_9 = arith.constant 0 : index
    %12 = vector.load %arg3[%c0_8, %c0_9] : memref<4x64xf32, #tpu.memory_space<vmem>>, vector<4x64xf32>
    tpu.vector_store %arg3[%c0_8, %c0_9], %11 {strides = array<i32>} : memref<4x64xf32, #tpu.memory_space<vmem>>, vector<4x64xf32>,
    return
  }
}

</mosaic_0001>

<bundles_post_ra>
// kernel: chan_attn.3
= control target key start
LH: loop header
LB: loop body
LE: loop exit
PB: predicated region body
PF: predicated region fallthrough
CT: control target
= control target key end

     0   :  { %vm23_vm0 = vcmask 523264   ;;  %vm53_vm1 = vcmask 1043456   ;;  %vm49_vm2 = vcmask 31744   ;;  %vm96_vm6 = vcmask 519168   ;;  %s163_s1 = inlined_call_operand.vmem [shape: f32[64,4], index: 1, kind: input, shape index: {}]   ;;  %s164_s0 = inlined_call_operand.vmem [shape: f32[4,64], index: 0, kind: input, shape index: {}]   ;;  %s165_s2 = inlined_call_operand.vmem [shape: f32[4,64], index: 2, kind: input, shape index: {}]   ;;  %s166_s3 = inlined_call_operand.vmem [shape: f32[4,64], index: 3, kind: output, shape index: {}]  }
   0x1   :  { %v22_v0 = vld [vmem:[%s163_s1 + $0x38] sm:$0xff]  ;;  %v21_v1 = vld [vmem:[%s163_s1 + $0x30] sm:$0xff]  ;;  %v20_v2 = vld [vmem:[%s163_s1 + $0x28] sm:$0xff] }
   0x2   :  { %35 = vmatpush.msra.mxu0 %v22_v0  ;;  %v19_v3 = vld [vmem:[%s163_s1 + $0x20] sm:$0xff]  ;;  %v18_v4 = vld [vmem:[%s163_s1 + $0x18] sm:$0xff]  ;;  %v17_v5 = vld [vmem:[%s163_s1 + $0x10] sm:$0xff] }
   0x3   :  { %v16_v6 = vld [vmem:[%s163_s1 + $0x8] sm:$0xff]  ;;  %v15_v7 = vld [vmem:[%s163_s1] sm:$0xff] }
   0x4   :  { %36 = vmatpush.msra.mxu0 %v21_v1  ;;  %v14_v8 = vld [vmem:[%s164_s0] sm:$0xf] }
   0x5   :  { %v48_v9 = vld [vmem:[%s165_s2] sm:$0xf] }
   0x6   :  { %37 = vmatpush.msra.mxu0 %v20_v2  ;;  %103 = vmatpush.msk.msra.mxu1 %vm53_vm1, %v48_v9 }
   0x8   :  { %38 = vmatpush.msra.mxu0 %v19_v3 }
   0xa   :  { %39 = vmatpush.msra.mxu0 %v18_v4 }
   0xc   :  { %40 = vmatpush.msra.mxu0 %v17_v5 }
   0xe   :  { %41 = vmatpush.msra.mxu0 %v16_v6 }
  0x10   :  { %42 = vmatpush.msra.mxu0 %v15_v7 }
  0x11   :  { %102 = vmatmul.msk.f32.vlgmr.msra.gmra.mxu0 %vm23_vm0, %v14_v8 }
  0x8e   :  { %v44_v10 = vpop.f32.mrf.mxu0 }
  0x8f   :  { %v47_v11 = vmax.f32 %v44_v10, 0.0 }
  0x91   :  { %104 = vmatmul.msk.f32.vlgmr.msra.gmra.mxu1 %vm49_vm2, %v47_v11 }
 0x10e   :  { %v74_v12 = vpop.f32.mrf.mxu1 }
 0x10f   :  { %v105_v13 = vmul.f32 -1.442695, %v74_v12 }
 0x111   :  { %106 = vpow2.f32 %v105_v13 }
 0x117   :  { %v107_v14 = vpop.eup %106 }
 0x118   :  { %v80_v15 = vadd.f32 1.0, %v107_v14 }
 0x11a   :  { %108 = vrcp.f32 %v80_v15  ;;  %v92_v19 = vand.u32 2147483648, %v80_v15  ;;  %v90_v21 = vand.u32 2147483647, %v80_v15  ;;  %vm86_vm4 = vweird.f32 %v80_v15 }
 0x11c   :  { %v93_v23 = vor.u32 1.1754944e-38, %v92_v19  ;;  %vm91_vm7 = vcmp.eq.f32.partialorder %v90_v21, 8.507059e+37 }
 0x120   :  { %v109_v16 = vpop.eup %108 }
 0x121   :  { %v82_v17 = vmul.f32 %v109_v16, %v80_v15  ;;  %vm87_vm3 = vweird.f32 %v109_v16 }
 0x122   :  { %vm88_vm5 = vmor %vm86_vm4, %vm87_vm3 }
 0x123   :  { %v83_v18 = vsub.f32 1.0, %v82_v17 }
 0x125   :  { %v84_v20 = vmul.f32 %v109_v16, %v83_v18 }
 0x127   :  { %v85_v22 = vadd.f32 %v109_v16, %v84_v20 }
 0x129   :  { %v89_v24 = vsel %vm88_vm5, %v109_v16, %v85_v22 }
 0x12a   :  { %v94_v25 = vsel %vm91_vm7, %v93_v23, %v89_v24 }
 0x12b   :  { %97 = vst.msk [vmem:[%s166_s3] sm:$0xf] %vm96_vm6, %v94_v25 }

// kernel: chan_attn.2
= control target key start
LH: loop header
LB: loop body
LE: loop exit
PB: predicated region body
PF: predicated region fallthrough
CT: control target
= control target key end

     0   :  { %s501_s6 = smov 0   ;;  %s503_s7 = smov 0   ;;  %s612_s0 = inlined_call_operand.vmem [shape: f32[2,64,256], index: 0, kind: input, shape index: {}]   ;;  %s613_s1 = inlined_call_operand.vmem [shape: f32[2,64,2], index: 1, kind: output, shape index: {}]  }
   0x1   :  { %s505_s8 = smov 0  }
   0x2 LB: > { %s23_s9 = sadd.s32 1, %s482_s7  ;;  %p428_p0 = scmp.ge.s32.totalorder %s486_s8, 1  ;;  %s486_s8 = sphi %s505_s8, %s11_s8   ;;  %s482_s7 = sphi %s503_s7, %s615_s7   ;;  %s478_s6 = sphi %s501_s6, %s614_s6  }
   0x3   : > { %p25_p1 = scmp.ge.s32.totalorder %s23_s9, 2  ;;  %p106_p2 = scmp.lt.s32.totalorder %s486_s8, 3 }
   0x5   : > { %s617_s9 = smov (%p25_p1, %s23_s9), 0  ;;  %p107_p3 = pnand %p428_p0, %p106_p2 }
   0x6   : > { %p131_p4 = scmp.lt.s32.totalorder (!%p107_p3), %s478_s6, 1  ;;  %s490_s14 = smov (!%p107_p3), 1  }
   0x7   : > { %110 = sbr.rel (%p107_p3) target bundleno = 277 (0x115), region = 24 }
   0xc   : > { %s619_s6 = smov (!%p131_p4, %s478_s6), 1  ;;  %vm149_vm0 = vcmask 7168   ;;  %v488_v22 = vmov -inf   ;;  %v489_v43 = vmov 0.0   ;;  %vm346_vm1 = vcmask 15368  }
   0xd   : > { %s435_s10 = sshll.u32 %s619_s6, 7  ;;  %160 = vst.msk [vmem:[#allocation3 + $0x10] sm:$0xff] %vm149_vm0, %v488_v22  ;;  %s436_s15 = sshll.u32 %s619_s6, 6 }
   0xe   : > { %s138_s13 = scalar_lea.vmem %s612_s0, %s435_s10  ;;  %158 = vst.msk [vmem:[#allocation3] sm:$0xff] %vm149_vm0, %v488_v22  ;;  %s568_s18 = scalar_lea.vmem %s613_s1, %s436_s15 }
   0xf   : > { %v170_v0 = vld [vmem:[%s138_s13 + $0x20] sm:$0xff]  ;;  %v171_v1 = vld [vmem:[%s138_s13 + $0x28] sm:$0xff]  ;;  %v172_v9 = vld [vmem:[%s138_s13 + $0x30] sm:$0xff]  ;;  %159 = vst.msk [vmem:[#allocation3 + $0x8] sm:$0xff] %vm149_vm0, %v488_v22 }
  0x10   : > { %v166_v2 = vld [vmem:[%s138_s13] sm:$0xff]  ;;  %v245_v3 = vmax.f32 %v170_v0, %v171_v1  ;;  %v167_v4 = vld [vmem:[%s138_s13 + $0x8] sm:$0xff]  ;;  %v173_v10 = vld [vmem:[%s138_s13 + $0x38] sm:$0xff]  ;;  %161 = vst.msk [vmem:[#allocation3 + $0x18] sm:$0xff] %vm149_vm0, %v488_v22  ;;  %v196_v26 = vadd.f32 %v171_v1, %v170_v0 }
  0x11   : > { %v174_v5 = vld [vmem:[%s138_s13 + $0x40] sm:$0xff]  ;;  %v175_v6 = vld [vmem:[%s138_s13 + $0x48] sm:$0xff]  ;;  %v239_v7 = vmax.f32 %v166_v2, %v167_v4  ;;  %v168_v11 = vld [vmem:[%s138_s13 + $0x10] sm:$0xff]  ;;  %v248_v15 = vmax.f32 %v172_v9, %v173_v10  ;;  %v190_v25 = vadd.f32 %v167_v4, %v166_v2  ;;  %162 = vst.msk [vmem:[#allocation3 + $0x20] sm:$0xff] %vm149_vm0, %v488_v22  ;;  %v199_v28 = vadd.f32 %v173_v10, %v172_v9 }
  0x12   : > { %v251_v8 = vmax.f32 %v174_v5, %v175_v6  ;;  %246 = vmax.xlane.f32.xlu1 %v245_v3  ;;  %v169_v12 = vld [vmem:[%s138_s13 + $0x18] sm:$0xff]  ;;  %v176_v13 = vld [vmem:[%s138_s13 + $0x50] sm:$0xff]  ;;  %v178_v20 = vld [vmem:[%s138_s13 + $0x60] sm:$0xff]  ;;  %163 = vst.msk [vmem:[#allocation3 + $0x28] sm:$0xff] %vm149_vm0, %v488_v22  ;;  %v202_v30 = vadd.f32 %v175_v6, %v174_v5 }
  0x13   : > { %240 = vmax.xlane.f32.xlu0 %v239_v7  ;;  %v177_v14 = vld [vmem:[%s138_s13 + $0x58] sm:$0xff]  ;;  %v242_v16 = vmax.f32 %v168_v11, %v169_v12  ;;  %v180_v18 = vld [vmem:[%s138_s13 + $0x70] sm:$0xff]  ;;  %v179_v21 = vld [vmem:[%s138_s13 + $0x68] sm:$0xff]  ;;  %164 = vst.msk [vmem:[#allocation3 + $0x30] sm:$0xff] %vm149_vm0, %v488_v22  ;;  %v193_v27 = vadd.f32 %v169_v12, %v168_v11 }
  0x14   : > { %252 = vmax.xlane.f32.xlu2 %v251_v8  ;;  %v254_v17 = vmax.f32 %v176_v13, %v177_v14  ;;  %v181_v19 = vld [vmem:[%s138_s13 + $0x78] sm:$0xff]  ;;  %v257_v24 = vmax.f32 %v178_v20, %v179_v21  ;;  %165 = vst.msk [vmem:[#allocation3 + $0x38] sm:$0xff] %vm149_vm0, %v488_v22  ;;  %v205_v29 = vadd.f32 %v177_v14, %v176_v13  ;;  %v233_v33 = vld [vmem:[#allocation3 + $0x10] sm:$0xff] }
  0x15   : > { %v260_v23 = vmax.f32 %v180_v18, %v181_v19  ;;  %v208_v31 = vadd.f32 %v179_v21, %v178_v20  ;;  %v211_v32 = vadd.f32 %v181_v19, %v180_v18  ;;  %v231_v34 = vld [vmem:[#allocation3] sm:$0xff]  ;;  %150 = vst.msk [vmem:[#allocation2] sm:$0xff] %vm149_vm0, %v489_v43 }
  0x16   : > { %v232_v44 = vld [vmem:[#allocation3 + $0x8] sm:$0xff]  ;;  %151 = vst.msk [vmem:[#allocation2 + $0x8] sm:$0xff] %vm149_vm0, %v489_v43 }
  0x17   : > { %v234_v42 = vld [vmem:[#allocation3 + $0x18] sm:$0xff]  ;;  %152 = vst.msk [vmem:[#allocation2 + $0x10] sm:$0xff] %vm149_vm0, %v489_v43 }
  0x18   : > { %v235_v35 = vld [vmem:[#allocation3 + $0x20] sm:$0xff]  ;;  %153 = vst.msk [vmem:[#allocation2 + $0x18] sm:$0xff] %vm149_vm0, %v489_v43 }
  0x19   : > { %v236_v45 = vld [vmem:[#allocation3 + $0x28] sm:$0xff]  ;;  %154 = vst.msk [vmem:[#allocation2 + $0x20] sm:$0xff] %vm149_vm0, %v489_v43 }
  0x1a   : > { %249 = vmax.xlane.f32.xlu1 %v248_v15  ;;  %155 = vst.msk [vmem:[#allocation2 + $0x28] sm:$0xff] %vm149_vm0, %v489_v43  ;;  %v237_v55 = vld [vmem:[#allocation3 + $0x30] sm:$0xff] }
  0x1b   : > { %243 = vmax.xlane.f32.xlu0 %v242_v16  ;;  %v238_v54 = vld [vmem:[#allocation3 + $0x38] sm:$0xff]  ;;  %156 = vst.msk [vmem:[#allocation2 + $0x30] sm:$0xff] %vm149_vm0, %v489_v43 }
  0x1c   : > { %255 = vmax.xlane.f32.xlu2 %v254_v17  ;;  %v182_v56 = vld [vmem:[#allocation2] sm:$0xff]  ;;  %157 = vst.msk [vmem:[#allocation2 + $0x38] sm:$0xff] %vm149_vm0, %v489_v43 }
  0x1d   : > { %v183_v4 = vld [vmem:[#allocation2 + $0x8] sm:$0xff] }
  0x1e   : > { %v184_v2 = vld [vmem:[#allocation2 + $0x10] sm:$0xff] }
  0x1f   : > { %v185_v3 = vld [vmem:[#allocation2 + $0x18] sm:$0xff] }
  0x20   : > { %v186_v15 = vld [vmem:[#allocation2 + $0x20] sm:$0xff] }
  0x21   : > { %v187_v13 = vld [vmem:[#allocation2 + $0x28] sm:$0xff] }
  0x22   : > { %261 = vmax.xlane.f32.xlu1 %v260_v23  ;;  %v188_v14 = vld [vmem:[#allocation2 + $0x30] sm:$0xff] }
  0x23   : > { %258 = vmax.xlane.f32.xlu0 %v257_v24 }
  0x24   : > { %191 = vadd.xlane.f32.xlu2 %v190_v25 }
  0x2a   : > { %197 = vadd.xlane.f32.xlu1 %v196_v26 }
  0x2b   : > { %194 = vadd.xlane.f32.xlu0 %v193_v27  ;;  %v189_v27 = vld [vmem:[#allocation2 + $0x38] sm:$0xff] }
  0x2c   : > { %200 = vadd.xlane.f32.xlu2 %v199_v28 }
  0x32   : > { %206 = vadd.xlane.f32.xlu1 %v205_v29 }
  0x33   : > { %203 = vadd.xlane.f32.xlu0 %v202_v30 }
  0x34   : > { %209 = vadd.xlane.f32.xlu2 %v208_v31 }
  0x3b   : > { %212 = vadd.xlane.f32.xlu0 %v211_v32 }
  0x85   : > { %v247_v36 = vpop.xlane.xlu1 %246 }
  0x86   : > { %v265_v37 = vmax.f32 %v233_v33, %v247_v36  ;;  %v241_v38 = vpop.xlane.xlu0 %240 }
  0x87   : > { %v253_v39 = vpop.xlane.xlu2 %252  ;;  %v263_v40 = vmax.f32 %v231_v34, %v241_v38 }
  0x88   : > { %v267_v41 = vmax.f32 %v235_v35, %v253_v39  ;;  %273 = vst.msk [vmem:[#allocation3 + $0x10] sm:$0xff] %vm149_vm0, %v265_v37 }
  0x89   : > { %271 = vst.msk [vmem:[#allocation3] sm:$0xff] %vm149_vm0, %v263_v40 }
  0x8a   : > { %275 = vst.msk [vmem:[#allocation3 + $0x20] sm:$0xff] %vm149_vm0, %v267_v41 }
  0x8d   : > { %v250_v46 = vpop.xlane.xlu1 %249 }
  0x8e   : > { %v266_v47 = vmax.f32 %v234_v42, %v250_v46  ;;  %v244_v48 = vpop.xlane.xlu0 %243 }
  0x8f   : > { %v256_v49 = vpop.xlane.xlu2 %255  ;;  %v264_v50 = vmax.f32 %v232_v44, %v244_v48  ;;  %v308_v51 = vld [vmem:[#allocation3 + $0x10] sm:$0xff] }
  0x90   : > { %v268_v52 = vmax.f32 %v236_v45, %v256_v49  ;;  %274 = vst.msk [vmem:[#allocation3 + $0x18] sm:$0xff] %vm149_vm0, %v266_v47  ;;  %326 = vrot.lane.b32.xlu0 %v308_v51, %s490_s14  ;;  %v306_v53 = vld [vmem:[#allocation3] sm:$0xff] }
  0x91   : > { %272 = vst.msk [vmem:[#allocation3 + $0x8] sm:$0xff] %vm149_vm0, %v264_v50  ;;  %322 = vrot.lane.b32.xlu1 %v306_v53, %s490_s14  ;;  %v310_v59 = vld [vmem:[#allocation3 + $0x20] sm:$0xff] }
  0x92   : > { %276 = vst.msk [vmem:[#allocation3 + $0x28] sm:$0xff] %vm149_vm0, %v268_v52 }
  0x95   : > { %v262_v57 = vpop.xlane.xlu1 %261 }
  0x96   : > { %v270_v58 = vmax.f32 %v238_v54, %v262_v57  ;;  %v259_v60 = vpop.xlane.xlu0 %258 }
  0x97   : > { %v192_v61 = vpop.xlane.xlu2 %191  ;;  %v269_v62 = vmax.f32 %v237_v55, %v259_v60  ;;  %v309_v12 = vld [vmem:[#allocation3 + $0x18] sm:$0xff] }
  0x98   : > { %v214_v63 = vadd.f32 %v192_v61, %v182_v56  ;;  %278 = vst.msk [vmem:[#allocation3 + $0x38] sm:$0xff] %vm149_vm0, %v270_v58  ;;  %v307_v0 = vld [vmem:[#allocation3 + $0x8] sm:$0xff] }
  0x99   : > { %330 = vrot.lane.b32.xlu1 %v310_v59, %s490_s14  ;;  %324 = vrot.lane.b32.xlu2 %v307_v0, %s490_s14  ;;  %v311_v1 = vld [vmem:[#allocation3 + $0x28] sm:$0xff]  ;;  %277 = vst.msk [vmem:[#allocation3 + $0x30] sm:$0xff] %vm149_vm0, %v269_v62 }
  0x9a   : > { %332 = vrot.lane.b32.xlu0 %v311_v1, %s490_s14  ;;  %223 = vst.msk [vmem:[#allocation2] sm:$0xff] %vm149_vm0, %v214_v63 }
  0x9d   : > { %v198_v5 = vpop.xlane.xlu1 %197 }
  0x9e   : > { %v216_v6 = vadd.f32 %v198_v5, %v184_v2  ;;  %v195_v8 = vpop.xlane.xlu0 %194 }
  0x9f   : > { %v201_v7 = vpop.xlane.xlu2 %200  ;;  %v313_v9 = vld [vmem:[#allocation3 + $0x38] sm:$0xff]  ;;  %v215_v11 = vadd.f32 %v195_v8, %v183_v4 }
  0xa0   : > { %v217_v10 = vadd.f32 %v201_v7, %v185_v3  ;;  %225 = vst.msk [vmem:[#allocation2 + $0x10] sm:$0xff] %vm149_vm0, %v216_v6  ;;  %v312_v17 = vld [vmem:[#allocation3 + $0x30] sm:$0xff] }
  0xa1   : > { %336 = vrot.lane.b32.xlu1 %v313_v9, %s490_s14  ;;  %328 = vrot.lane.b32.xlu2 %v309_v12, %s490_s14  ;;  %224 = vst.msk [vmem:[#allocation2 + $0x8] sm:$0xff] %vm149_vm0, %v215_v11  ;;  %v282_v32 = vld [vmem:[#allocation2] sm:$0xff] }
  0xa2   : > { %226 = vst.msk [vmem:[#allocation2 + $0x18] sm:$0xff] %vm149_vm0, %v217_v10  ;;  %v290_v34 = vmul.f32 0.00390625, %v282_v32 }
  0xa4   : > { %298 = vst.msk [vmem:[%s568_s18] sm:$0xff] %vm149_vm0, %v290_v34 }
  0xa5   : > { %v207_v16 = vpop.xlane.xlu1 %206 }
  0xa6   : > { %v219_v18 = vadd.f32 %v207_v16, %v187_v13  ;;  %v204_v20 = vpop.xlane.xlu0 %203 }
  0xa7   : > { %v210_v19 = vpop.xlane.xlu2 %209  ;;  %v218_v22 = vadd.f32 %v204_v20, %v186_v15  ;;  %v284_v25 = vld [vmem:[#allocation2 + $0x10] sm:$0xff] }
  0xa8   : > { %v220_v21 = vadd.f32 %v210_v19, %v188_v14  ;;  %228 = vst.msk [vmem:[#allocation2 + $0x28] sm:$0xff] %vm149_vm0, %v219_v18  ;;  %v283_v23 = vld [vmem:[#allocation2 + $0x8] sm:$0xff]  ;;  %v292_v26 = vmul.f32 0.00390625, %v284_v25 }
  0xa9   : > { %334 = vrot.lane.b32.xlu2 %v312_v17, %s490_s14  ;;  %227 = vst.msk [vmem:[#allocation2 + $0x20] sm:$0xff] %vm149_vm0, %v218_v22  ;;  %v291_v24 = vmul.f32 0.00390625, %v283_v23  ;;  %v285_v29 = vld [vmem:[#allocation2 + $0x18] sm:$0xff] }
  0xaa   : > { %229 = vst.msk [vmem:[#allocation2 + $0x30] sm:$0xff] %vm149_vm0, %v220_v21  ;;  %v293_v31 = vmul.f32 0.00390625, %v285_v29 }
  0xab   : > { %299 = vst.msk [vmem:[%s568_s18 + $0x8] sm:$0xff] %vm149_vm0, %v291_v24 }
  0xac   : > { %300 = vst.msk [vmem:[%s568_s18 + $0x10] sm:$0xff] %vm149_vm0, %v292_v26 }
  0xad   : > { %301 = vst.msk [vmem:[%s568_s18 + $0x18] sm:$0xff] %vm149_vm0, %v293_v31 }
  0xae   : > { %v213_v28 = vpop.xlane.xlu0 %212 }
  0xaf   : > { %v221_v30 = vadd.f32 %v213_v28, %v189_v27  ;;  %v287_v33 = vld [vmem:[#allocation2 + $0x28] sm:$0xff] }
  0xb0   : > { %v295_v35 = vmul.f32 0.00390625, %v287_v33  ;;  %v286_v36 = vld [vmem:[#allocation2 + $0x20] sm:$0xff] }
  0xb1   : > { %230 = vst.msk [vmem:[#allocation2 + $0x38] sm:$0xff] %vm149_vm0, %v221_v30  ;;  %v294_v37 = vmul.f32 0.00390625, %v286_v36  ;;  %v288_v40 = vld [vmem:[#allocation2 + $0x30] sm:$0xff] }
  0xb2   : > { %303 = vst.msk [vmem:[%s568_s18 + $0x28] sm:$0xff] %vm149_vm0, %v295_v35  ;;  %v296_v41 = vmul.f32 0.00390625, %v288_v40 }
  0xb3   : > { %302 = vst.msk [vmem:[%s568_s18 + $0x20] sm:$0xff] %vm149_vm0, %v294_v37 }
  0xb4   : > { %304 = vst.msk [vmem:[%s568_s18 + $0x30] sm:$0xff] %vm149_vm0, %v296_v41 }
  0xb8   : > { %v289_v38 = vld [vmem:[#allocation2 + $0x38] sm:$0xff] }
  0xb9   : > { %v297_v39 = vmul.f32 0.00390625, %v289_v38 }
  0xbb   : > { %305 = vst.msk [vmem:[%s568_s18 + $0x38] sm:$0xff] %vm149_vm0, %v297_v39 }
  0xf3   : > { %v325_v42 = vpop.permute.xlu2 %324 }
  0xf4   : > { %348 = vst.msk [vmem:[%s568_s18 + $0x8] sm:$0xff] %vm346_vm1, %v325_v42 }
  0xfb   : > { %v329_v43 = vpop.permute.xlu2 %328 }
  0xfc   : > { %350 = vst.msk [vmem:[%s568_s18 + $0x18] sm:$0xff] %vm346_vm1, %v329_v43 }
 0x102   : > { %v327_v44 = vpop.permute.xlu0 %326 }
 0x103   : > { %v323_v45 = vpop.permute.xlu1 %322  ;;  %349 = vst.msk [vmem:[%s568_s18 + $0x10] sm:$0xff] %vm346_vm1, %v327_v44  ;;  %v335_v46 = vpop.permute.xlu2 %334 }
 0x104   : > { %347 = vst.msk [vmem:[%s568_s18] sm:$0xff] %vm346_vm1, %v323_v45 }
 0x105   : > { %353 = vst.msk [vmem:[%s568_s18 + $0x30] sm:$0xff] %vm346_vm1, %v335_v46 }
 0x10b   : > { %v331_v47 = vpop.permute.xlu1 %330 }
 0x10c   : > { %351 = vst.msk [vmem:[%s568_s18 + $0x20] sm:$0xff] %vm346_vm1, %v331_v47  ;;  %v333_v48 = vpop.permute.xlu0 %332 }
 0x10d   : > { %352 = vst.msk [vmem:[%s568_s18 + $0x28] sm:$0xff] %vm346_vm1, %v333_v48 }
 0x113   : > { %v337_v49 = vpop.permute.xlu1 %336 }
 0x114   : > { %354 = vst.msk [vmem:[%s568_s18 + $0x38] sm:$0xff] %vm346_vm1, %v337_v49 }
 0x115 PF: > { %s11_s8 = sadd.s32 1, %s486_s8   ;;  %s614_s6 = smov %s482_s7 }
 0x116   : > { %p8_p5 = scmp.ge.s32.totalorder %s11_s8, 4   ;;  %s615_s7 = smov %s617_s9 }
 0x118   :  { %10 = sbr.rel (!%p8_p5) target bundleno = 2 (0x2), region = 62 }

</bundles_post_ra>
